<compile_context>
chip_gen: v7x
topology: tpu7x:2x2x1
jax: 0.10.0
libtpu: 0.0.40
codegen_flags: <defaults>
</compile_context>

<pallas_src>
import functools

import jax
import jax.numpy as jnp
from jax.experimental import pallas as pl
from jax.experimental.pallas import tpu as pltpu


def _cp_kernel(w_ref, x_ref, y_ref, z_ref, o_ref, xy_ref, *, nonneg: bool,
               dim_x: int, dim_y: int):
    """Reconstruct the CP tensor as a single (X*Y, Z) matmul.

    w_ref : (1, R)      CP weights
    x_ref : (X, R)      x factor
    y_ref : (Y, R)      y factor
    z_ref : (Z, R)      z factor
    o_ref : (X*Y, Z)    flattened output tensor (row = i*Y + j)
    xy_ref: (X*Y, R)    VMEM scratch for the Khatri-Rao product of x and y
    """
    w = w_ref[...]            # (1, R)
    x = x_ref[...]            # (X, R)
    y = y_ref[...]            # (Y, R)
    z = z_ref[...]            # (Z, R)
    if nonneg:
        x = jnp.abs(x)
        y = jnp.abs(y)
        z = jnp.abs(z)

    # Fold the CP weights into the x factor once (VPU work, done one-shot).
    xw = x * w                # (X, R)

    # Khatri-Rao operand: xy[i*Y + j, r] = xw[i, r] * y[j, r].
    # dim_x is small -> static unroll; each store is a sublane-aligned block
    # (offsets are multiples of dim_y), so these are cheap dense vreg stores.
    for i in range(dim_x):
        xy_ref[pl.ds(i * dim_y, dim_y), :] = xw[i:i + 1, :] * y

    # Single MXU matmul contracting the rank axis of both operands
    # (rhs contracts on its last dim -> no explicit z transpose through the XLU).
    out = jax.lax.dot_general(
        xy_ref[...], z,
        dimension_numbers=(((1,), (1,)), ((), ())),
        preferred_element_type=jnp.float32,
    )
    o_ref[...] = out.astype(o_ref.dtype)   # one dense (X*Y, Z) store


def cp_decomposition_forward(weights, x_hidden, y_hidden, z_hidden, *, nonneg=True):
    """Pallas equivalent of CPDecomposition.forward()."""
    dim_x, rank = x_hidden.shape
    dim_y, _ = y_hidden.shape
    dim_z, _ = z_hidden.shape

    kernel = functools.partial(_cp_kernel, nonneg=nonneg, dim_x=dim_x, dim_y=dim_y)

    elem_bytes = 4  # f32
    cost = pl.CostEstimate(
        flops=2 * dim_x * dim_y * dim_z * rank + 2 * dim_x * dim_y * rank,
        transcendentals=0,
        bytes_accessed=elem_bytes * (rank + dim_x * rank + dim_y * rank
                                     + dim_z * rank + dim_x * dim_y * dim_z),
    )

    vmem = pltpu.MemorySpace.VMEM
    out2d = pl.pallas_call(
        kernel,
        out_shape=jax.ShapeDtypeStruct((dim_x * dim_y, dim_z), x_hidden.dtype),
        in_specs=[
            pl.BlockSpec(memory_space=vmem),   # weights (as 2D)
            pl.BlockSpec(memory_space=vmem),   # x factor
            pl.BlockSpec(memory_space=vmem),   # y factor
            pl.BlockSpec(memory_space=vmem),   # z factor
        ],
        out_specs=pl.BlockSpec(memory_space=vmem),
        scratch_shapes=[pltpu.VMEM((dim_x * dim_y, rank), jnp.float32)],
        cost_estimate=cost,
    )(weights.reshape(1, rank), x_hidden, y_hidden, z_hidden)

    # Layout plumbing only: (X*Y, Z) -> (X, Y, Z).
    return out2d.reshape(dim_x, dim_y, dim_z)


if __name__ == "__main__":
    # Module __init__: weights = ones(R); factors ~ U[0,1) of shapes
    # (dim_x, R), (dim_y, R), (dim_z, R).  Deterministic init via PRNGKey(0).
    dim_x, dim_y, dim_z, dim_hidden = 16, 8, 128, 8

    key = jax.random.PRNGKey(0)
    kx, ky, kz = jax.random.split(key, 3)
    weights = jnp.ones((dim_hidden,), dtype=jnp.float32)
    x_hidden = jax.random.uniform(kx, (dim_x, dim_hidden), dtype=jnp.float32)
    y_hidden = jax.random.uniform(ky, (dim_y, dim_hidden), dtype=jnp.float32)
    z_hidden = jax.random.uniform(kz, (dim_z, dim_hidden), dtype=jnp.float32)

    out = cp_decomposition_forward(weights, x_hidden, y_hidden, z_hidden, nonneg=True)
    out = jax.block_until_ready(out)

    # Pure-JAX reference (same math as tl.cp_to_tensor with abs'd factors).
    ref = jnp.einsum(
        "r,xr,yr,zr->xyz",
        weights,
        jnp.abs(x_hidden),
        jnp.abs(y_hidden),
        jnp.abs(z_hidden),
    )
    assert out.shape == (dim_x, dim_y, dim_z)
    assert out.dtype == jnp.float32
    assert jnp.allclose(out, ref, atol=1e-5, rtol=1e-5)

    print("KERNEL_OK")
</pallas_src>

<mosaic_0001>
module attributes {stable_mosaic.version = 11 : i64} {
  func.func @_cp_kernel(%arg0: memref<1x8xf32, #tpu.memory_space<vmem>>, %arg1: memref<16x8xf32, #tpu.memory_space<vmem>>, %arg2: memref<8x8xf32, #tpu.memory_space<vmem>>, %arg3: memref<128x8xf32, #tpu.memory_space<vmem>>, %arg4: memref<128x128xf32, #tpu.memory_space<vmem>>, %arg5: memref<128x8xf32, #tpu.memory_space<vmem>>) attributes {dimension_semantics = [], scalar_prefetch = 0 : i64, scratch_operands = 1 : i64, tpu.core_type = #tpu.core_type<tc>} {
    %c0 = arith.constant 0 : index
    %c0_0 = arith.constant 0 : index
    %0 = vector.load %arg0[%c0, %c0_0] : memref<1x8xf32, #tpu.memory_space<vmem>>, vector<1x8xf32>
    %c0_1 = arith.constant 0 : index
    %c0_2 = arith.constant 0 : index
    %1 = vector.load %arg1[%c0_1, %c0_2] : memref<16x8xf32, #tpu.memory_space<vmem>>, vector<16x8xf32>
    %c0_3 = arith.constant 0 : index
    %c0_4 = arith.constant 0 : index
    %2 = vector.load %arg2[%c0_3, %c0_4] : memref<8x8xf32, #tpu.memory_space<vmem>>, vector<8x8xf32>
    %c0_5 = arith.constant 0 : index
    %c0_6 = arith.constant 0 : index
    %3 = vector.load %arg3[%c0_5, %c0_6] : memref<128x8xf32, #tpu.memory_space<vmem>>, vector<128x8xf32>
    %4 = math.absf %1 : vector<16x8xf32>
    %5 = math.absf %2 : vector<8x8xf32>
    %6 = math.absf %3 : vector<128x8xf32>
    %7 = vector.broadcast %0 : vector<1x8xf32> to vector<16x8xf32>
    %8 = arith.mulf %4, %7 : vector<16x8xf32>
    %9 = vector.extract_strided_slice %8 {offsets = [0, 0], sizes = [1, 8], strides = [1, 1]} : vector<16x8xf32> to vector<1x8xf32>
    %10 = vector.broadcast %9 : vector<1x8xf32> to vector<8x8xf32>
    %11 = arith.mulf %10, %5 : vector<8x8xf32>
    %c0_7 = arith.constant 0 : index
    %c0_8 = arith.constant 0 : index
    %12 = vector.load %arg5[%c0_7, %c0_8] : memref<128x8xf32, #tpu.memory_space<vmem>>, vector<8x8xf32>
    tpu.vector_store %arg5[%c0_7, %c0_8], %11 {strides = array<i32>} : memref<128x8xf32, #tpu.memory_space<vmem>>, vector<8x8xf32>,
    %13 = vector.extract_strided_slice %8 {offsets = [1, 0], sizes = [1, 8], strides = [1, 1]} : vector<16x8xf32> to vector<1x8xf32>
    %14 = vector.broadcast %13 : vector<1x8xf32> to vector<8x8xf32>
    %15 = arith.mulf %14, %5 : vector<8x8xf32>
    %c8 = arith.constant 8 : index
    %c0_9 = arith.constant 0 : index
    %16 = vector.load %arg5[%c8, %c0_9] : memref<128x8xf32, #tpu.memory_space<vmem>>, vector<8x8xf32>
    tpu.vector_store %arg5[%c8, %c0_9], %15 {strides = array<i32>} : memref<128x8xf32, #tpu.memory_space<vmem>>, vector<8x8xf32>,
    %17 = vector.extract_strided_slice %8 {offsets = [2, 0], sizes = [1, 8], strides = [1, 1]} : vector<16x8xf32> to vector<1x8xf32>
    %18 = vector.broadcast %17 : vector<1x8xf32> to vector<8x8xf32>
    %19 = arith.mulf %18, %5 : vector<8x8xf32>
    %c16 = arith.constant 16 : index
    %c0_10 = arith.constant 0 : index
    %20 = vector.load %arg5[%c16, %c0_10] : memref<128x8xf32, #tpu.memory_space<vmem>>, vector<8x8xf32>
    tpu.vector_store %arg5[%c16, %c0_10], %19 {strides = array<i32>} : memref<128x8xf32, #tpu.memory_space<vmem>>, vector<8x8xf32>,
    %21 = vector.extract_strided_slice %8 {offsets = [3, 0], sizes = [1, 8], strides = [1, 1]} : vector<16x8xf32> to vector<1x8xf32>
    %22 = vector.broadcast %21 : vector<1x8xf32> to vector<8x8xf32>
    %23 = arith.mulf %22, %5 : vector<8x8xf32>
    %c24 = arith.constant 24 : index
    %c0_11 = arith.constant 0 : index
    %24 = vector.load %arg5[%c24, %c0_11] : memref<128x8xf32, #tpu.memory_space<vmem>>, vector<8x8xf32>
    tpu.vector_store %arg5[%c24, %c0_11], %23 {strides = array<i32>} : memref<128x8xf32, #tpu.memory_space<vmem>>, vector<8x8xf32>,
    %25 = vector.extract_strided_slice %8 {offsets = [4, 0], sizes = [1, 8], strides = [1, 1]} : vector<16x8xf32> to vector<1x8xf32>
    %26 = vector.broadcast %25 : vector<1x8xf32> to vector<8x8xf32>
    %27 = arith.mulf %26, %5 : vector<8x8xf32>
    %c32 = arith.constant 32 : index
    %c0_12 = arith.constant 0 : index
    %28 = vector.load %arg5[%c32, %c0_12] : memref<128x8xf32, #tpu.memory_space<vmem>>, vector<8x8xf32>
    tpu.vector_store %arg5[%c32, %c0_12], %27 {strides = array<i32>} : memref<128x8xf32, #tpu.memory_space<vmem>>, vector<8x8xf32>,
    %29 = vector.extract_strided_slice %8 {offsets = [5, 0], sizes = [1, 8], strides = [1, 1]} : vector<16x8xf32> to vector<1x8xf32>
    %30 = vector.broadcast %29 : vector<1x8xf32> to vector<8x8xf32>
    %31 = arith.mulf %30, %5 : vector<8x8xf32>
    %c40 = arith.constant 40 : index
    %c0_13 = arith.constant 0 : index
    %32 = vector.load %arg5[%c40, %c0_13] : memref<128x8xf32, #tpu.memory_space<vmem>>, vector<8x8xf32>
    tpu.vector_store %arg5[%c40, %c0_13], %31 {strides = array<i32>} : memref<128x8xf32, #tpu.memory_space<vmem>>, vector<8x8xf32>,
    %33 = vector.extract_strided_slice %8 {offsets = [6, 0], sizes = [1, 8], strides = [1, 1]} : vector<16x8xf32> to vector<1x8xf32>
    %34 = vector.broadcast %33 : vector<1x8xf32> to vector<8x8xf32>
    %35 = arith.mulf %34, %5 : vector<8x8xf32>
    %c48 = arith.constant 48 : index
    %c0_14 = arith.constant 0 : index
    %36 = vector.load %arg5[%c48, %c0_14] : memref<128x8xf32, #tpu.memory_space<vmem>>, vector<8x8xf32>
    tpu.vector_store %arg5[%c48, %c0_14], %35 {strides = array<i32>} : memref<128x8xf32, #tpu.memory_space<vmem>>, vector<8x8xf32>,
    %37 = vector.extract_strided_slice %8 {offsets = [7, 0], sizes = [1, 8], strides = [1, 1]} : vector<16x8xf32> to vector<1x8xf32>
    %38 = vector.broadcast %37 : vector<1x8xf32> to vector<8x8xf32>
    %39 = arith.mulf %38, %5 : vector<8x8xf32>
    %c56 = arith.constant 56 : index
    %c0_15 = arith.constant 0 : index
    %40 = vector.load %arg5[%c56, %c0_15] : memref<128x8xf32, #tpu.memory_space<vmem>>, vector<8x8xf32>
    tpu.vector_store %arg5[%c56, %c0_15], %39 {strides = array<i32>} : memref<128x8xf32, #tpu.memory_space<vmem>>, vector<8x8xf32>,
    %41 = vector.extract_strided_slice %8 {offsets = [8, 0], sizes = [1, 8], strides = [1, 1]} : vector<16x8xf32> to vector<1x8xf32>
    %42 = vector.broadcast %41 : vector<1x8xf32> to vector<8x8xf32>
    %43 = arith.mulf %42, %5 : vector<8x8xf32>
    %c64 = arith.constant 64 : index
    %c0_16 = arith.constant 0 : index
    %44 = vector.load %arg5[%c64, %c0_16] : memref<128x8xf32, #tpu.memory_space<vmem>>, vector<8x8xf32>
    tpu.vector_store %arg5[%c64, %c0_16], %43 {strides = array<i32>} : memref<128x8xf32, #tpu.memory_space<vmem>>, vector<8x8xf32>,
    %45 = vector.extract_strided_slice %8 {offsets = [9, 0], sizes = [1, 8], strides = [1, 1]} : vector<16x8xf32> to vector<1x8xf32>
    %46 = vector.broadcast %45 : vector<1x8xf32> to vector<8x8xf32>
    %47 = arith.mulf %46, %5 : vector<8x8xf32>
    %c72 = arith.constant 72 : index
    %c0_17 = arith.constant 0 : index
    %48 = vector.load %arg5[%c72, %c0_17] : memref<128x8xf32, #tpu.memory_space<vmem>>, vector<8x8xf32>
    tpu.vector_store %arg5[%c72, %c0_17], %47 {strides = array<i32>} : memref<128x8xf32, #tpu.memory_space<vmem>>, vector<8x8xf32>,
    %49 = vector.extract_strided_slice %8 {offsets = [10, 0], sizes = [1, 8], strides = [1, 1]} : vector<16x8xf32> to vector<1x8xf32>
    %50 = vector.broadcast %49 : vector<1x8xf32> to vector<8x8xf32>
    %51 = arith.mulf %50, %5 : vector<8x8xf32>
    %c80 = arith.constant 80 : index
    %c0_18 = arith.constant 0 : index
    %52 = vector.load %arg5[%c80, %c0_18] : memref<128x8xf32, #tpu.memory_space<vmem>>, vector<8x8xf32>
    tpu.vector_store %arg5[%c80, %c0_18], %51 {strides = array<i32>} : memref<128x8xf32, #tpu.memory_space<vmem>>, vector<8x8xf32>,
    %53 = vector.extract_strided_slice %8 {offsets = [11, 0], sizes = [1, 8], strides = [1, 1]} : vector<16x8xf32> to vector<1x8xf32>
    %54 = vector.broadcast %53 : vector<1x8xf32> to vector<8x8xf32>
    %55 = arith.mulf %54, %5 : vector<8x8xf32>
    %c88 = arith.constant 88 : index
    %c0_19 = arith.constant 0 : index
    %56 = vector.load %arg5[%c88, %c0_19] : memref<128x8xf32, #tpu.memory_space<vmem>>, vector<8x8xf32>
    tpu.vector_store %arg5[%c88, %c0_19], %55 {strides = array<i32>} : memref<128x8xf32, #tpu.memory_space<vmem>>, vector<8x8xf32>,
    %57 = vector.extract_strided_slice %8 {offsets = [12, 0], sizes = [1, 8], strides = [1, 1]} : vector<16x8xf32> to vector<1x8xf32>
    %58 = vector.broadcast %57 : vector<1x8xf32> to vector<8x8xf32>
    %59 = arith.mulf %58, %5 : vector<8x8xf32>
    %c96 = arith.constant 96 : index
    %c0_20 = arith.constant 0 : index
    %60 = vector.load %arg5[%c96, %c0_20] : memref<128x8xf32, #tpu.memory_space<vmem>>, vector<8x8xf32>
    tpu.vector_store %arg5[%c96, %c0_20], %59 {strides = array<i32>} : memref<128x8xf32, #tpu.memory_space<vmem>>, vector<8x8xf32>,
    %61 = vector.extract_strided_slice %8 {offsets = [13, 0], sizes = [1, 8], strides = [1, 1]} : vector<16x8xf32> to vector<1x8xf32>
    %62 = vector.broadcast %61 : vector<1x8xf32> to vector<8x8xf32>
    %63 = arith.mulf %62, %5 : vector<8x8xf32>
    %c104 = arith.constant 104 : index
    %c0_21 = arith.constant 0 : index
    %64 = vector.load %arg5[%c104, %c0_21] : memref<128x8xf32, #tpu.memory_space<vmem>>, vector<8x8xf32>
    tpu.vector_store %arg5[%c104, %c0_21], %63 {strides = array<i32>} : memref<128x8xf32, #tpu.memory_space<vmem>>, vector<8x8xf32>,
    %65 = vector.extract_strided_slice %8 {offsets = [14, 0], sizes = [1, 8], strides = [1, 1]} : vector<16x8xf32> to vector<1x8xf32>
    %66 = vector.broadcast %65 : vector<1x8xf32> to vector<8x8xf32>
    %67 = arith.mulf %66, %5 : vector<8x8xf32>
    %c112 = arith.constant 112 : index
    %c0_22 = arith.constant 0 : index
    %68 = vector.load %arg5[%c112, %c0_22] : memref<128x8xf32, #tpu.memory_space<vmem>>, vector<8x8xf32>
    tpu.vector_store %arg5[%c112, %c0_22], %67 {strides = array<i32>} : memref<128x8xf32, #tpu.memory_space<vmem>>, vector<8x8xf32>,
    %69 = vector.extract_strided_slice %8 {offsets = [15, 0], sizes = [1, 8], strides = [1, 1]} : vector<16x8xf32> to vector<1x8xf32>
    %70 = vector.broadcast %69 : vector<1x8xf32> to vector<8x8xf32>
    %71 = arith.mulf %70, %5 : vector<8x8xf32>
    %c120 = arith.constant 120 : index
    %c0_23 = arith.constant 0 : index
    %72 = vector.load %arg5[%c120, %c0_23] : memref<128x8xf32, #tpu.memory_space<vmem>>, vector<8x8xf32>
    tpu.vector_store %arg5[%c120, %c0_23], %71 {strides = array<i32>} : memref<128x8xf32, #tpu.memory_space<vmem>>, vector<8x8xf32>,
    %c0_24 = arith.constant 0 : index
    %c0_25 = arith.constant 0 : index
    %73 = vector.load %arg5[%c0_24, %c0_25] : memref<128x8xf32, #tpu.memory_space<vmem>>, vector<128x8xf32>
    %cst = arith.constant dense<0.000000e+00> : vector<128x128xf32>
    %74 = tpu.matmul %73, %6, %cst {dimension_numbers = #tpu.dot_dimension_numbers<[1], [1], [0], [0], [0, 0, 1, 0], [], []>} : vector<128x8xf32>, vector<128x8xf32>, vector<128x128xf32> -> vector<128x128xf32>
    %c0_26 = arith.constant 0 : index
    %c0_27 = arith.constant 0 : index
    %75 = vector.load %arg4[%c0_26, %c0_27] : memref<128x128xf32, #tpu.memory_space<vmem>>, vector<128x128xf32>
    tpu.vector_store %arg4[%c0_26, %c0_27], %74 {strides = array<i32>} : memref<128x128xf32, #tpu.memory_space<vmem>>, vector<128x128xf32>,
    return
  }
}

</mosaic_0001>

<bundles_post_ra>
// kernel: tpu_custom_call.1
= control target key start
LH: loop header
LB: loop body
LE: loop exit
PB: predicated region body
PF: predicated region fallthrough
CT: control target
= control target key end

     0   :  { %vm70_vm0 = vcmask 64512   ;;  %v65_v15 = vlaneseq  ;;  %s905_s0 = inlined_call_operand.vmem [shape: f32[1,8], index: 0, kind: input, shape index: {}]   ;;  %s906_s1 = inlined_call_operand.vmem [shape: f32[16,8], index: 1, kind: input, shape index: {}]   ;;  %s907_s2 = inlined_call_operand.vmem [shape: f32[8,8], index: 2, kind: input, shape index: {}]   ;;  %s908_s3 = inlined_call_operand.vmem [shape: f32[128,8], index: 3, kind: input, shape index: {}]   ;;  %s909_s4 = inlined_call_operand.hbm [shape: f32[128,128], index: 4, kind: output, shape index: {}]  }
   0x1   :  { %v22_v0 = vld [vmem:[%s908_s3] sm:$0xff]  ;;  %v23_v1 = vld [vmem:[%s908_s3 + $0x8] sm:$0xff]  ;;  %v24_v2 = vld [vmem:[%s908_s3 + $0x10] sm:$0xff] }
   0x2   :  { %v41_v3 = vand.u32 2147483647, %v22_v0  ;;  %v42_v4 = vand.u32 2147483647, %v23_v1  ;;  %v25_v5 = vld [vmem:[%s908_s3 + $0x18] sm:$0xff]  ;;  %vm705_vm1 = vmpackc.low %vm70_vm0, %vm70_vm0  ;;  %v26_v10 = vld [vmem:[%s908_s3 + $0x20] sm:$0xff] }
   0x3   :  { %v43_v7 = vand.u32 2147483647, %v24_v2  ;;  %v44_v8 = vand.u32 2147483647, %v25_v5  ;;  %v27_v11 = vld [vmem:[%s908_s3 + $0x28] sm:$0xff]  ;;  %v28_v13 = vld [vmem:[%s908_s3 + $0x30] sm:$0xff] }
   0x4   :  { %v572_v9 = vpack.c.bf16 %v42_v4, %v41_v3  ;;  %v29_v14 = vld [vmem:[%s908_s3 + $0x38] sm:$0xff]  ;;  %v45_v16 = vand.u32 2147483647, %v26_v10  ;;  %v46_v17 = vand.u32 2147483647, %v27_v11  ;;  %v19_v18 = vld [vmem:[%s906_s1] sm:$0xff] }
   0x5   :  { %v578_v12 = vpack.c.bf16 %v44_v8, %v43_v7  ;;  %v47_v19 = vand.u32 2147483647, %v28_v13  ;;  %v48_v20 = vand.u32 2147483647, %v29_v14  ;;  %v451_v21 = vld [vmem:[%s905_s0] ss:$0 sm:$0xff] }
   0x6   :  { %574 = vmatprep.subr.msk.bf16.mxu0 %vm705_vm1, %v572_v9  ;;  %620 = vmatprep.subr.msk.bf16.mxu1 %vm705_vm1, %v572_v9  ;;  %v21_v22 = vld [vmem:[%s907_s2] sm:$0xff]  ;;  %v38_v23 = vand.u32 2147483647, %v19_v18  ;;  %v742_v24 = vshrl.u32 %v65_v15, 7  ;;  %v20_v25 = vld [vmem:[%s906_s1 + $0x8] sm:$0xff]  ;;  %v747_v26 = vpack.c.bf16 %v46_v17, %v45_v16 }
   0x7   :  { %577 = vmatpush3.bf16.xpose.msk.msra.mxu0 %vm705_vm1, %v572_v9  ;;  %628 = vmatpush3.bf16.xpose.msk.msra.mxu1 %vm705_vm1, %v572_v9  ;;  %v749_v27 = vand.u32 2147483647, %v21_v22  ;;  %v39_v28 = vand.u32 2147483647, %v20_v25 }
   0x8   :  { %580 = vmatprep.subr.msk.bf16.mxu0 %vm705_vm1, %v578_v12  ;;  %621 = vmatprep.subr.msk.bf16.mxu1 %vm705_vm1, %v578_v12 }
   0x9   :  { %9 = vsyncpa [#allocation4], 0  ;;  %v63_v29 = vmul.f32 %v451_v21, %v38_v23  ;;  %v67_v30 = vsub.s32 0, %v742_v24  ;;  %v74_v31 = vsub.s32 1, %v742_v24  ;;  %v80_v32 = vsub.s32 2, %v742_v24  ;;  %v30_v1 = vld [vmem:[%s908_s3 + $0x40] sm:$0xff] }
   0xa   :  { %v754_v33 = vpack.c.bf16 %v48_v20, %v47_v19  ;;  %v64_v34 = vmul.f32 %v451_v21, %v39_v28  ;;  %v86_v35 = vsub.s32 3, %v742_v24  ;;  %v92_v36 = vsub.s32 4, %v742_v24  ;;  %v31_v2 = vld [vmem:[%s908_s3 + $0x48] sm:$0xff]  ;;  %v32_v16 = vld [vmem:[%s908_s3 + $0x50] sm:$0xff]  ;;  %v33_v17 = vld [vmem:[%s908_s3 + $0x58] sm:$0xff] }
   0xb   :  { %v68_v37 = vrot.slane %v63_v29, %v67_v30  ;;  %v75_v38 = vrot.slane %v63_v29, %v74_v31  ;;  %v81_v39 = vrot.slane %v63_v29, %v80_v32  ;;  %v98_v40 = vsub.s32 5, %v742_v24  ;;  %v34_v21 = vld [vmem:[%s908_s3 + $0x60] sm:$0xff]  ;;  %v35_v22 = vld [vmem:[%s908_s3 + $0x68] sm:$0xff] }
   0xc   :  { %v117_v41 = vrot.slane %v64_v34, %v67_v30  ;;  %v123_v42 = vrot.slane %v64_v34, %v74_v31  ;;  %v129_v43 = vrot.slane %v64_v34, %v80_v32  ;;  %v104_v44 = vsub.s32 6, %v742_v24 }
   0xd   :  { %v69_v45 = vmul.f32 %v68_v37, %v749_v27  ;;  %v76_v46 = vmul.f32 %v75_v38, %v749_v27  ;;  %v82_v47 = vmul.f32 %v81_v39, %v749_v27  ;;  %v110_v48 = vsub.s32 7, %v742_v24 }
   0xe   :  { %v118_v49 = vmul.f32 %v117_v41, %v749_v27  ;;  %v124_v50 = vmul.f32 %v123_v42, %v749_v27  ;;  %v130_v51 = vmul.f32 %v129_v43, %v749_v27  ;;  %v87_v52 = vrot.slane %v63_v29, %v86_v35 }
   0xf   :  { %583 = vmatpush3.bf16.xpose.msk.msra.mxu0 %vm705_vm1, %v578_v12  ;;  %629 = vmatpush3.bf16.xpose.msk.msra.mxu1 %vm705_vm1, %v578_v12  ;;  %71 = vst.msk [vmem:[#allocation2] sm:$0xff] %vm70_vm0, %v69_v45  ;;  %77 = vst.msk [vmem:[#allocation2 + $0x8] sm:$0xff] %vm70_vm0, %v76_v46  ;;  %v135_v53 = vrot.slane %v64_v34, %v86_v35  ;;  %v93_v54 = vrot.slane %v63_v29, %v92_v36  ;;  %v49_v10 = vand.u32 2147483647, %v30_v1 }
  0x10   :  { %586 = vmatprep.subr.msk.bf16.mxu0 %vm705_vm1, %v747_v26  ;;  %622 = vmatprep.subr.msk.bf16.mxu1 %vm705_vm1, %v747_v26  ;;  %83 = vst.msk [vmem:[#allocation2 + $0x10] sm:$0xff] %vm70_vm0, %v82_v47  ;;  %v141_v55 = vrot.slane %v64_v34, %v92_v36  ;;  %v99_v56 = vrot.slane %v63_v29, %v98_v40  ;;  %119 = vst.msk [vmem:[#allocation2 + $0x40] sm:$0xff] %vm70_vm0, %v118_v49  ;;  %v50_v11 = vand.u32 2147483647, %v31_v2 }
  0x11   :  { %125 = vst.msk [vmem:[#allocation2 + $0x48] sm:$0xff] %vm70_vm0, %v124_v50  ;;  %131 = vst.msk [vmem:[#allocation2 + $0x50] sm:$0xff] %vm70_vm0, %v130_v51  ;;  %v88_v57 = vmul.f32 %v87_v52, %v749_v27  ;;  %v147_v58 = vrot.slane %v64_v34, %v98_v40  ;;  %v105_v59 = vrot.slane %v63_v29, %v104_v44  ;;  %v51_v18 = vand.u32 2147483647, %v32_v16 }
  0x12   :  { %v153_v60 = vrot.slane %v64_v34, %v104_v44  ;;  %v136_v61 = vmul.f32 %v135_v53, %v749_v27  ;;  %v94_v62 = vmul.f32 %v93_v54, %v749_v27  ;;  %v142_v63 = vmul.f32 %v141_v55, %v749_v27 }
  0x13   :  { %v100_v0 = vmul.f32 %v99_v56, %v749_v27  ;;  %89 = vst.msk [vmem:[#allocation2 + $0x18] sm:$0xff] %vm70_vm0, %v88_v57  ;;  %v148_v3 = vmul.f32 %v147_v58, %v749_v27  ;;  %v106_v4 = vmul.f32 %v105_v59, %v749_v27  ;;  %v111_v7 = vrot.slane %v63_v29, %v110_v48 }
  0x14   :  { %v154_v5 = vmul.f32 %v153_v60, %v749_v27  ;;  %137 = vst.msk [vmem:[#allocation2 + $0x58] sm:$0xff] %vm70_vm0, %v136_v61  ;;  %95 = vst.msk [vmem:[#allocation2 + $0x20] sm:$0xff] %vm70_vm0, %v94_v62  ;;  %v159_v8 = vrot.slane %v64_v34, %v110_v48  ;;  %v596_v15 = vpack.c.bf16 %v50_v11, %v49_v10  ;;  %v52_v19 = vand.u32 2147483647, %v33_v17 }
  0x15   :  { %143 = vst.msk [vmem:[#allocation2 + $0x60] sm:$0xff] %vm70_vm0, %v142_v63  ;;  %101 = vst.msk [vmem:[#allocation2 + $0x28] sm:$0xff] %vm70_vm0, %v100_v0  ;;  %v112_v9 = vmul.f32 %v111_v7, %v749_v27  ;;  %v53_v23 = vand.u32 2147483647, %v34_v21  ;;  %v54_v24 = vand.u32 2147483647, %v35_v22 }
  0x16   :  { %149 = vst.msk [vmem:[#allocation2 + $0x68] sm:$0xff] %vm70_vm0, %v148_v3  ;;  %107 = vst.msk [vmem:[#allocation2 + $0x30] sm:$0xff] %vm70_vm0, %v106_v4  ;;  %v160_v12 = vmul.f32 %v159_v8, %v749_v27  ;;  %v162_v13 = vld [vmem:[#allocation2] sm:$0xff]  ;;  %v602_v20 = vpack.c.bf16 %v52_v19, %v51_v18  ;;  %v37_v27 = vld [vmem:[%s908_s3 + $0x78] sm:$0xff] }
  0x17   :  { %589 = vmatpush3.bf16.xpose.msk.msra.mxu0 %vm705_vm1, %v747_v26  ;;  %630 = vmatpush3.bf16.xpose.msk.msra.mxu1 %vm705_vm1, %v747_v26  ;;  %155 = vst.msk [vmem:[#allocation2 + $0x70] sm:$0xff] %vm70_vm0, %v154_v5  ;;  %113 = vst.msk [vmem:[#allocation2 + $0x38] sm:$0xff] %vm70_vm0, %v112_v9  ;;  %v170_v14 = vld [vmem:[#allocation2 + $0x40] sm:$0xff]  ;;  %v608_v25 = vpack.c.bf16 %v54_v24, %v53_v23  ;;  %v36_v26 = vld [vmem:[%s908_s3 + $0x70] sm:$0xff]  ;;  %v56_v29 = vand.u32 2147483647, %v37_v27 }
  0x18   :  { %592 = vmatprep.subr.msk.bf16.mxu0 %vm705_vm1, %v754_v33  ;;  %623 = vmatprep.subr.msk.bf16.mxu1 %vm705_vm1, %v754_v33  ;;  %161 = vst.msk [vmem:[#allocation2 + $0x78] sm:$0xff] %vm70_vm0, %v160_v12  ;;  %v55_v28 = vand.u32 2147483647, %v36_v26  ;;  %v163_v31 = vld [vmem:[#allocation2 + $0x8] sm:$0xff]  ;;  %v172_v34 = vld [vmem:[#allocation2 + $0x50] sm:$0xff]  ;;  %s663_s3 = smov [#allocation3]  }
  0x19   :  { %548 = vmatprep.mubr.msk.f32.mxu0 %vm70_vm0, %v162_v13  ;;  %560 = vmatprep.mubr.msk.f32.mxu1 %vm70_vm0, %v170_v14  ;;  %v171_v32 = vld [vmem:[#allocation2 + $0x48] sm:$0xff]  ;;  %s440_s26 = sshll.u32 %s663_s3, 4  ;;  %s441_s26 = int_to_ptr.vmem [resolvable:$true] %s440_s26 }
  0x1a   :  { %v614_v30 = vpack.c.bf16 %v56_v29, %v55_v28  ;;  %v165_v35 = vld [vmem:[#allocation2 + $0x18] sm:$0xff]  ;;  %s639_s27 = scalar_lea.vmem %s441_s26, 2048  ;;  %p644_p1 = scmp.lt.s32.totalorder %s441_s26, %s441_s26 }
  0x1b   :  { %v173_v36 = vld [vmem:[#allocation2 + $0x58] sm:$0xff]  ;;  %v166_v37 = vld [vmem:[#allocation2 + $0x20] sm:$0xff]  ;;  %p640_p0 = scmp.ne.s32.totalorder %s441_s26, %s639_s27  ;;  %p645_p2 = scmp.lt.s32.totalorder %s639_s27, %s639_s27 }
  0x1c   :  { %v174_v38 = vld [vmem:[#allocation2 + $0x60] sm:$0xff]  ;;  %v167_v6 = vld [vmem:[#allocation2 + $0x28] sm:$0xff] }
  0x1d   :  { %v175_v39 = vld [vmem:[#allocation2 + $0x68] sm:$0xff]  ;;  %v168_v40 = vld [vmem:[#allocation2 + $0x30] sm:$0xff]  ;;  %p646_p3 = por %p645_p2, %p644_p1 }
  0x1e   :  { %v176_v41 = vld [vmem:[#allocation2 + $0x70] sm:$0xff]  ;;  %v169_v42 = vld [vmem:[#allocation2 + $0x38] sm:$0xff] }
  0x1f   :  { %595 = vmatpush3.bf16.xpose.msk.msra.mxu0 %vm705_vm1, %v754_v33  ;;  %631 = vmatpush3.bf16.xpose.msk.msra.mxu1 %vm705_vm1, %v754_v33  ;;  %v164_v33 = vld [vmem:[#allocation2 + $0x10] sm:$0xff]  ;;  %v177_v43 = vld [vmem:[#allocation2 + $0x78] sm:$0xff]  ;;  %p647_p4 = pnand %p646_p3, %p640_p0 }
  0x20   :  { %598 = vmatprep.subr.msk.bf16.mxu0 %vm705_vm1, %v596_v15  ;;  %624 = vmatprep.subr.msk.bf16.mxu1 %vm705_vm1, %v596_v15 }
  0x27   :  { %601 = vmatpush3.bf16.xpose.msk.msra.mxu0 %vm705_vm1, %v596_v15  ;;  %632 = vmatpush3.bf16.xpose.msk.msra.mxu1 %vm705_vm1, %v596_v15 }
  0x28   :  { %604 = vmatprep.subr.msk.bf16.mxu0 %vm705_vm1, %v602_v20  ;;  %625 = vmatprep.subr.msk.bf16.mxu1 %vm705_vm1, %v602_v20 }
  0x2f   :  { %607 = vmatpush3.bf16.xpose.msk.msra.mxu0 %vm705_vm1, %v602_v20  ;;  %633 = vmatpush3.bf16.xpose.msk.msra.mxu1 %vm705_vm1, %v602_v20 }
  0x30   :  { %610 = vmatprep.subr.msk.bf16.mxu0 %vm705_vm1, %v608_v25  ;;  %626 = vmatprep.subr.msk.bf16.mxu1 %vm705_vm1, %v608_v25 }
  0x37   :  { %613 = vmatpush3.bf16.xpose.msk.msra.mxu0 %vm705_vm1, %v608_v25  ;;  %634 = vmatpush3.bf16.xpose.msk.msra.mxu1 %vm705_vm1, %v608_v25 }
  0x38   :  { %616 = vmatprep.subr.msk.bf16.mxu0 %vm705_vm1, %v614_v30  ;;  %627 = vmatprep.subr.msk.bf16.mxu1 %vm705_vm1, %v614_v30 }
  0x3f   :  { %619 = vmatpush3.bf16.xpose.msk.msra.mxu0 %vm705_vm1, %v614_v30  ;;  %635 = vmatpush3.bf16.xpose.msk.msra.mxu1 %vm705_vm1, %v614_v30 }
  0x46   :  { %549 = vmatmul.mubr.msk.f32.vlgmr.msra.gmra.mrb[0].mxu0 %vm70_vm0, %v163_v31  ;;  %561 = vmatmul.mubr.msk.f32.vlgmr.msra.gmra.mrb[0].mxu1 %vm70_vm0, %v171_v32 }
  0x47   :  { %551 = vmatprep.mubr.msk.f32.mxu0 %vm70_vm0, %v164_v33  ;;  %563 = vmatprep.mubr.msk.f32.mxu1 %vm70_vm0, %v172_v34 }
  0x4a   :  { %552 = vmatmul.mubr.msk.f32.gmra.mrb[2].mxu0 %vm70_vm0, %v165_v35  ;;  %564 = vmatmul.mubr.msk.f32.gmra.mrb[2].mxu1 %vm70_vm0, %v173_v36 }
  0x4b   :  { %554 = vmatprep.mubr.msk.f32.mxu0 %vm70_vm0, %v166_v37  ;;  %566 = vmatprep.mubr.msk.f32.mxu1 %vm70_vm0, %v174_v38 }
  0x4e   :  { %555 = vmatmul.mubr.msk.f32.gmra.mrb[4].mxu0 %vm70_vm0, %v167_v6  ;;  %567 = vmatmul.mubr.msk.f32.gmra.mrb[4].mxu1 %vm70_vm0, %v175_v39 }
  0x4f   :  { %557 = vmatprep.mubr.msk.f32.mxu0 %vm70_vm0, %v168_v40  ;;  %569 = vmatprep.mubr.msk.f32.mxu1 %vm70_vm0, %v176_v41 }
  0x52   :  { %558 = vmatmul.mubr.msk.f32.gmra.mrb[6].mxu0 %vm70_vm0, %v169_v42  ;;  %570 = vmatmul.mubr.msk.f32.gmra.mrb[6].mxu1 %vm70_vm0, %v177_v43 }
 0x119   :  { %v550_v44 = vpop.f32.mrb[0].mxu0  ;;  %v562_v45 = vpop.f32.mrb[0].mxu1 }
 0x11a   :  { %420 = vst [vmem:[#allocation3 + $0x8] sm:$0xff] %v550_v44  ;;  %428 = vst [vmem:[#allocation3 + $0x48] sm:$0xff] %v562_v45  ;;  %v340_v46 = vpop.f32.mrb[1].mxu0  ;;  %v380_v47 = vpop.f32.mrb[1].mxu1 }
 0x11b   :  { %419 = vst [vmem:[#allocation3] sm:$0xff] %v340_v46  ;;  %427 = vst [vmem:[#allocation3 + $0x40] sm:$0xff] %v380_v47 }
 0x11d   :  { %v553_v48 = vpop.f32.mrb[2].mxu0  ;;  %v565_v49 = vpop.f32.mrb[2].mxu1 }
 0x11e   :  { %422 = vst [vmem:[#allocation3 + $0x18] sm:$0xff] %v553_v48  ;;  %430 = vst [vmem:[#allocation3 + $0x58] sm:$0xff] %v565_v49  ;;  %v350_v50 = vpop.f32.mrb[3].mxu0  ;;  %v390_v51 = vpop.f32.mrb[3].mxu1 }
 0x11f   :  { %421 = vst [vmem:[#allocation3 + $0x10] sm:$0xff] %v350_v50  ;;  %429 = vst [vmem:[#allocation3 + $0x50] sm:$0xff] %v390_v51 }
 0x121   :  { %v556_v52 = vpop.f32.mrb[4].mxu0  ;;  %v568_v53 = vpop.f32.mrb[4].mxu1 }
 0x122   :  { %424 = vst [vmem:[#allocation3 + $0x28] sm:$0xff] %v556_v52  ;;  %432 = vst [vmem:[#allocation3 + $0x68] sm:$0xff] %v568_v53  ;;  %v360_v54 = vpop.f32.mrb[5].mxu0  ;;  %v400_v55 = vpop.f32.mrb[5].mxu1 }
 0x123   :  { %423 = vst [vmem:[#allocation3 + $0x20] sm:$0xff] %v360_v54  ;;  %431 = vst [vmem:[#allocation3 + $0x60] sm:$0xff] %v400_v55 }
 0x125   :  { %v559_v56 = vpop.f32.mrb[6].mxu0  ;;  %v571_v57 = vpop.f32.mrb[6].mxu1 }
 0x126   :  { %426 = vst [vmem:[#allocation3 + $0x38] sm:$0xff] %v559_v56  ;;  %434 = vst [vmem:[#allocation3 + $0x78] sm:$0xff] %v571_v57  ;;  %v370_v58 = vpop.f32.mrb[7].mxu0  ;;  %v410_v59 = vpop.f32.mrb[7].mxu1 }
 0x127   :  { %425 = vst [vmem:[#allocation3 + $0x30] sm:$0xff] %v370_v58  ;;  %433 = vst [vmem:[#allocation3 + $0x70] sm:$0xff] %v410_v59 }
 0x128   :  { %650 = shalt.err (!%p647_p4)
}
 0x129   :  { %s651_s30 = scalar_lea.hbm %s909_s4, 2048 }
 0x12a   :  { %p652_p5 = scmp.ne.s32.totalorder %s909_s4, %s651_s30  ;;  %p655_p6 = scmp.lt.u32.totalorder %s651_s30, %s909_s4 }
 0x12c   :  { %p657_p7 = pnand %p655_p6, %p652_p5 }
 0x12e   :  { %660 = shalt.err (!%p657_p7)
}
 0x12f   :  { %s664_s9 = smov 128   ;;  %s665_s10 = smov 8  }
 0x130   :  { %446 = dma.vmem_to_hbm [thread:$0]  %s441_s26, 2048, %s909_s4, [#allocation4], %s664_s9, %s664_s9, %s665_s10  }
 0x131   :  { %661 = dma.done.wait [#allocation4], 2048  }
 0x132   :  { %662 = vsyncadd [#allocation4], 4294965248 }
 0x133   :  { %450 = vsyncpa [#allocation4], 1 }

</bundles_post_ra>
